<compile_context>
chip_gen: v5e
topology: v5e:2x2
jax: 0.10.0
libtpu: 0.0.40
codegen_flags: <defaults>
</compile_context>

<pallas_src>
import math
from functools import partial

import jax
import jax.numpy as jnp
from jax.experimental import pallas as pl
from jax.experimental.pallas import tpu as pltpu


LANE = 128     # N padding: full MXU tile width -> lane-dense, unmasked stores
SUBLANE = 8    # f32 sublane multiple for the row tile


def _round_up(x, m):
    return ((x + m - 1) // m) * m


def _cdiv(a, b):
    return (a + b - 1) // b


# ------------------------------ Pallas kernel ------------------------------ #
def _grouped_linear_kernel(x_tbl, w_tbl, o_tbl, x_ref, w_ref, b_ref, o_ref):
    """One grid step = one (tile_m, OUT_PAD) output block of one edge type.

    x_ref : (tile_m, in_size)      activation row tile (re-DMA'd only when the
                                   x block index changes; reused across etypes
                                   sharing this srctype thanks to the ordering)
    w_ref : (E, in_size, OUT_PAD)  full weight stack, VMEM-resident all grid
    b_ref : (E, 1, OUT_PAD)        full bias stack,   VMEM-resident all grid
    """
    del x_tbl, o_tbl                       # consumed only by the index_maps
    e = w_tbl[pl.program_id(0)]            # etype id from SMEM prefetch table
    acc = jnp.dot(x_ref[...], w_ref[e], preferred_element_type=jnp.float32)
    o_ref[...] = (acc + b_ref[e]).astype(o_ref.dtype)


def _grouped_linear(x_tbl, w_tbl, o_tbl, x_all, w_stack, b_stack, *, tile_m):
    """Grouped linear:  for grid step i,
         out_block[o_tbl[i]] = X_block[x_tbl[i]] @ W[w_tbl[i]] + b[w_tbl[i]]
    x_all:   [R, in_size]          (R multiple of tile_m, no K padding in HBM)
    w_stack: [E, in_size, OUT_PAD]
    b_stack: [E, 1, OUT_PAD]
    returns  [num_steps * tile_m, OUT_PAD]  float32
    """
    num_steps = x_tbl.shape[0]
    in_size = x_all.shape[1]
    out_pad = w_stack.shape[2]

    flops = 2 * num_steps * tile_m * in_size * out_pad
    bytes_accessed = (
        x_all.size * x_all.dtype.itemsize            # each activation block streamed once
        + w_stack.size * w_stack.dtype.itemsize      # weight stack: single resident DMA
        + b_stack.size * b_stack.dtype.itemsize
        + num_steps * tile_m * out_pad * 4           # f32 output tiles
    )

    return pl.pallas_call(
        _grouped_linear_kernel,
        out_shape=jax.ShapeDtypeStruct((num_steps * tile_m, out_pad), jnp.float32),
        grid_spec=pltpu.PrefetchScalarGridSpec(
            num_scalar_prefetch=3,
            grid=(num_steps,),
            in_specs=[
                # activation row tile, selected through the SMEM block table
                pl.BlockSpec((tile_m, in_size), lambda i, xt, wt, ot: (xt[i], 0)),
                # full weight / bias stacks: constant index map => one DMA,
                # resident for the whole grid; etype picked inside the kernel
                pl.BlockSpec(w_stack.shape, lambda i, xt, wt, ot: (0, 0, 0)),
                pl.BlockSpec(b_stack.shape, lambda i, xt, wt, ot: (0, 0, 0)),
            ],
            out_specs=pl.BlockSpec((tile_m, out_pad),
                                   lambda i, xt, wt, ot: (ot[i], 0)),
        ),
        compiler_params=pltpu.CompilerParams(
            # independent row tiles -> megacore sharding on v7x
            dimension_semantics=("parallel",),
            # explicit limit: v5e's default scoped VMEM is only 16 MiB
            vmem_limit_bytes=32 * 1024 * 1024,
        ),
        cost_estimate=pl.CostEstimate(
            flops=flops, transcendentals=0, bytes_accessed=bytes_accessed),
    )(x_tbl, w_tbl, o_tbl, x_all, w_stack, b_stack)


# ---------------- whole forward path fused under one jit ------------------- #
@partial(jax.jit, static_argnames=("plan",))
def _hetero_forward(feats, w_stack, b_stack, *, plan):
    (tile_m, out_size, cd_name, sizes, x_tbl, w_tbl, o_tbl, msg_info) = plan
    compute_dtype = jnp.dtype(cd_name)

    # pack all (used) node-type features into one slab [R, in_size],
    # rows padded per node type to a multiple of tile_m
    padded = [jnp.pad(f, ((0, n_pad - r), (0, 0))).astype(compute_dtype)
              for f, (r, n_pad) in zip(feats, sizes)]
    x_all = jnp.concatenate(padded, axis=0)

    y = _grouped_linear(
        jnp.asarray(x_tbl, jnp.int32),
        jnp.asarray(w_tbl, jnp.int32),
        jnp.asarray(o_tbl, jnp.int32),
        x_all, w_stack, b_stack, tile_m=tile_m)

    # per canonical etype: contiguous (etype-major) output region -> slice
    return tuple(y[r0:r0 + rows, :out_size] for (r0, rows) in msg_info)


# ------------------------------ HeteroRGCNLayer ----------------------------- #
class HeteroRGCNLayerPallas:
    """Pallas-TPU implementation of HeteroRGCNLayer.forward.

    As in the PyTorch module, the returned dict equals the input feat_dict
    (the second loop of forward() overwrites every entry); the per-etype
    transformed features Wh are exposed via `self.last_messages`.
    """

    def __init__(self, in_size, out_size, etype_dict, key, *,
                 max_tile_m=512, compute_dtype=jnp.float32):
        assert max_tile_m % SUBLANE == 0
        self.in_size = in_size
        self.out_size = out_size
        self.out_pad = _round_up(max(out_size, 1), LANE)
        self.etype_dict = dict(etype_dict)
        self.max_tile_m = max_tile_m
        self.compute_dtype = jnp.dtype(compute_dtype)

        names = sorted(set(self.etype_dict.values()))
        self.name_to_idx = {n: i for i, n in enumerate(names)}

        bound = 1.0 / math.sqrt(in_size)
        self.weight = {}
        w_stack, b_stack = [], []
        for name in names:  # deterministic per-etype Linear params
            key, kw, kb = jax.random.split(key, 3)
            w = jax.random.uniform(kw, (in_size, out_size), jnp.float32, -bound, bound)
            b = jax.random.uniform(kb, (1, out_size), jnp.float32, -bound, bound)
            self.weight[name] = (w, b)
            # only the N dim is padded (to a full 128-lane MXU tile); the K dim
            # (in_size) is left unpadded in HBM per the perf review
            w_stack.append(jnp.pad(w, ((0, 0), (0, self.out_pad - out_size))))
            b_stack.append(jnp.pad(b, ((0, 0), (0, self.out_pad - out_size))))
        # resident parameter stacks: [E, in_size, OUT_PAD] / [E, 1, OUT_PAD]
        self.w_stack = jnp.stack(w_stack, axis=0).astype(self.compute_dtype)
        self.b_stack = jnp.stack(b_stack, axis=0)          # bias kept f32
        self.last_messages = {}

    def _pick_tile_m(self, max_rows, n_etypes):
        tm = min(self.max_tile_m, _round_up(max(max_rows, 1), SUBLANE))
        # keep >= ~8 grid steps so the "parallel" axis feeds both v7x TCs
        while tm > 64 and n_etypes * _cdiv(max_rows, tm) < 8:
            tm //= 2
        return max(SUBLANE, tm)

    def __call__(self, canonical_etypes, feat_dict):
        canonical_etypes = list(canonical_etypes)
        srctypes = sorted({s for (s, _, _) in canonical_etypes})
        rows = {nt: feat_dict[nt].shape[0] for nt in srctypes}
        max_rows = max(rows.values())
        tile_m = self._pick_tile_m(max_rows, len(canonical_etypes))

        # per-node-type packing layout in the x_all slab
        sizes, blk_off, n_blocks = [], {}, {}
        off = 0
        for nt in srctypes:
            nb = _cdiv(max(rows[nt], 1), tile_m)
            n_blocks[nt] = nb
            blk_off[nt] = off
            sizes.append((rows[nt], nb * tile_m))
            off += nb

        # output layout: etype-major, contiguous per etype (simple slicing)
        out_off, msg_info = [], []
        acc = 0
        for (s, _, _) in canonical_etypes:
            out_off.append(acc)
            msg_info.append((acc * tile_m, rows[s]))
            acc += n_blocks[s]

        # grid enumeration: x-block-major so consecutive steps that share a
        # srctype reuse the activation tile already sitting in VMEM
        x_tbl, w_tbl, o_tbl = [], [], []
        for nt in srctypes:
            for t in range(n_blocks[nt]):
                for j, (s, e, d) in enumerate(canonical_etypes):
                    if s != nt:
                        continue
                    x_tbl.append(blk_off[nt] + t)
                    w_tbl.append(self.name_to_idx[self.etype_dict[(s, e, d)]])
                    o_tbl.append(out_off[j] + t)

        plan = (tile_m, self.out_size, self.compute_dtype.name,
                tuple(sizes), tuple(x_tbl), tuple(w_tbl), tuple(o_tbl),
                tuple(msg_info))
        feats = tuple(feat_dict[nt] for nt in srctypes)
        msgs = _hetero_forward(feats, self.w_stack, self.b_stack, plan=plan)

        self.last_messages = {ce: m for ce, m in zip(canonical_etypes, msgs)}

        # faithful to the PyTorch forward: the second loop overwrites every
        # entry with the original input features, so the returned dict equals
        # feat_dict.
        # TODO(synk): the reference module discards Wh (no message passing /
        # aggregation step exists in its forward), so none is implemented here.
        new_feat_dict = {k: [] for k in feat_dict.keys()}
        for (s, e, d) in canonical_etypes:
            new_feat_dict[s].append(self.last_messages[(s, e, d)])
        for tp in new_feat_dict:
            new_feat_dict[tp] = feat_dict[tp]
        return new_feat_dict


# ----------------------------------- main ----------------------------------- #
if __name__ == "__main__":
    key = jax.random.PRNGKey(0)

    in_size, out_size = 32, 32
    n_user, n_item = 8, 16

    # small synthetic heterogeneous graph structure
    canonical_etypes = [
        ("user", "follows", "user"),
        ("user", "buys", "item"),
        ("item", "bought-by", "user"),
    ]
    etype_dict = {
        ("user", "follows", "user"): "follows",
        ("user", "buys", "item"): "buys",
        ("item", "bought-by", "user"): "bought-by",
    }

    key, k_u, k_i, k_params = jax.random.split(key, 4)
    feat_dict = {
        "user": jax.random.normal(k_u, (n_user, in_size), jnp.float32),
        "item": jax.random.normal(k_i, (n_item, in_size), jnp.float32),
    }

    layer = HeteroRGCNLayerPallas(in_size, out_size, etype_dict, k_params)

    out = layer(canonical_etypes, feat_dict)
    jax.tree_util.tree_map(jax.block_until_ready, out)
    jax.tree_util.tree_map(jax.block_until_ready, layer.last_messages)

    # (a) forward semantics: returned dict equals the input features
    for k in feat_dict:
        assert out[k].shape == feat_dict[k].shape
        assert bool(jnp.all(out[k] == feat_dict[k]))

    # (b) the fused Pallas grouped-linear matches a pure-JAX reference
    for (srctype, etype, dsttype) in canonical_etypes:
        w, b = layer.weight[etype_dict[(srctype, etype, dsttype)]]
        ref = feat_dict[srctype] @ w + b
        got = layer.last_messages[(srctype, etype, dsttype)]
        assert got.shape == ref.shape
        assert bool(jnp.allclose(got, ref, atol=1e-4, rtol=1e-4))

    print("KERNEL_OK")
</pallas_src>

<mosaic_0001>
module attributes {stable_mosaic.version = 11 : i64} {
  func.func @_grouped_linear_kernel(%arg0: i32, %arg1: memref<3xi32, #tpu.memory_space<smem>>, %arg2: memref<3xi32, #tpu.memory_space<smem>>, %arg3: memref<3xi32, #tpu.memory_space<smem>>, %arg4: memref<16x32xf32, #tpu.memory_space<vmem>>, %arg5: memref<3x32x128xf32, #tpu.memory_space<vmem>>, %arg6: memref<3x1x128xf32, #tpu.memory_space<vmem>>, %arg7: memref<16x128xf32, #tpu.memory_space<vmem>>) attributes {dimension_semantics = [#tpu.dimension_semantics<parallel>], iteration_bounds = array<i64: 3>, scalar_prefetch = 3 : i64, scratch_operands = 0 : i64, tpu.core_type = #tpu.core_type<tc>, window_params = [{transform_indices = @transform_0, window_bounds = array<i64: 16, 32>}, {pipeline_mode = #tpu.pipeline_mode<synchronous>, transform_indices = @transform_1, window_bounds = array<i64: 3, 32, 128>}, {pipeline_mode = #tpu.pipeline_mode<synchronous>, transform_indices = @transform_2, window_bounds = array<i64: 3, 1, 128>}, {transform_indices = @transform_3, window_bounds = array<i64: 16, 128>}]} {
    %0 = arith.index_cast %arg0 : i32 to index
    %1 = memref.load %arg2[%0] : memref<3xi32, #tpu.memory_space<smem>>
    %c0 = arith.constant 0 : index
    %c0_0 = arith.constant 0 : index
    %2 = vector.load %arg4[%c0, %c0_0] : memref<16x32xf32, #tpu.memory_space<vmem>>, vector<16x32xf32>
    %3 = arith.index_cast %1 : i32 to index
    %c0_1 = arith.constant 0 : index
    %c0_2 = arith.constant 0 : index
    %4 = vector.load %arg5[%3, %c0_1, %c0_2] : memref<3x32x128xf32, #tpu.memory_space<vmem>>, vector<1x32x128xf32>
    %5 = vector.shape_cast %4 : vector<1x32x128xf32> to vector<32x128xf32>
    %cst = arith.constant dense<0.000000e+00> : vector<16x128xf32>
    %6 = tpu.matmul %2, %5, %cst {dimension_numbers = #tpu.dot_dimension_numbers<[1], [0], [0], [1], [0, 0, 1, 1], [], []>} : vector<16x32xf32>, vector<32x128xf32>, vector<16x128xf32> -> vector<16x128xf32>
    %7 = arith.index_cast %1 : i32 to index
    %c0_3 = arith.constant 0 : index
    %c0_4 = arith.constant 0 : index
    %8 = vector.load %arg6[%7, %c0_3, %c0_4] : memref<3x1x128xf32, #tpu.memory_space<vmem>>, vector<1x1x128xf32>
    %9 = vector.shape_cast %8 : vector<1x1x128xf32> to vector<1x128xf32>
    %10 = vector.broadcast %9 : vector<1x128xf32> to vector<16x128xf32>
    %11 = arith.addf %6, %10 : vector<16x128xf32>
    %c0_5 = arith.constant 0 : index
    %c0_6 = arith.constant 0 : index
    %12 = vector.load %arg7[%c0_5, %c0_6] : memref<16x128xf32, #tpu.memory_space<vmem>>, vector<16x128xf32>
    tpu.vector_store %arg7[%c0_5, %c0_6], %11 {strides = array<i32>} : memref<16x128xf32, #tpu.memory_space<vmem>>, vector<16x128xf32>,
    return
  }
  func.func @transform_0(%arg0: i32, %arg1: memref<3xi32, #tpu.memory_space<smem>>, %arg2: memref<3xi32, #tpu.memory_space<smem>>, %arg3: memref<3xi32, #tpu.memory_space<smem>>) -> (i32, i32) {
    %0 = arith.index_cast %arg0 : i32 to index
    %1 = memref.load %arg1[%0] : memref<3xi32, #tpu.memory_space<smem>>
    %c0_i32 = arith.constant 0 : i32
    %c0_i32_0 = arith.constant 0 : i32
    return %1, %c0_i32 : i32, i32
  }
  func.func @transform_1(%arg0: i32, %arg1: memref<3xi32, #tpu.memory_space<smem>>, %arg2: memref<3xi32, #tpu.memory_space<smem>>, %arg3: memref<3xi32, #tpu.memory_space<smem>>) -> (i32, i32, i32) {
    %c0_i32 = arith.constant 0 : i32
    %c0_i32_0 = arith.constant 0 : i32
    %c0_i32_1 = arith.constant 0 : i32
    %c0_i32_2 = arith.constant 0 : i32
    return %c0_i32, %c0_i32_0, %c0_i32_1 : i32, i32, i32
  }
  func.func @transform_2(%arg0: i32, %arg1: memref<3xi32, #tpu.memory_space<smem>>, %arg2: memref<3xi32, #tpu.memory_space<smem>>, %arg3: memref<3xi32, #tpu.memory_space<smem>>) -> (i32, i32, i32) {
    %c0_i32 = arith.constant 0 : i32
    %c0_i32_0 = arith.constant 0 : i32
    %c0_i32_1 = arith.constant 0 : i32
    %c0_i32_2 = arith.constant 0 : i32
    return %c0_i32, %c0_i32_0, %c0_i32_1 : i32, i32, i32
  }
  func.func @transform_3(%arg0: i32, %arg1: memref<3xi32, #tpu.memory_space<smem>>, %arg2: memref<3xi32, #tpu.memory_space<smem>>, %arg3: memref<3xi32, #tpu.memory_space<smem>>) -> (i32, i32) {
    %0 = arith.index_cast %arg0 : i32 to index
    %1 = memref.load %arg3[%0] : memref<3xi32, #tpu.memory_space<smem>>
    %c0_i32 = arith.constant 0 : i32
    %c0_i32_0 = arith.constant 0 : i32
    return %1, %c0_i32 : i32, i32
  }
}

</mosaic_0001>

<bundles_post_ra>
// kernel: _hetero_forward.1
= control target key start
LH: loop header
LB: loop body
LE: loop exit
PB: predicated region body
PF: predicated region fallthrough
CT: control target
= control target key end

     0   :  { %s469_s27 = smov [#allocation3]   ;;  %s470_s28 = smov [#allocation4]   ;;  %s552_s0 = inlined_call_operand.vmem [shape: s32[3], index: 0, kind: input, shape index: {}]   ;;  %s553_s3 = inlined_call_operand.vmem [shape: f32[32,32], index: 3, kind: input, shape index: {}]   ;;  %s554_s4 = inlined_call_operand.hbm [shape: f32[3,32,128], index: 4, kind: input, shape index: {}]   ;;  %s555_s5 = inlined_call_operand.vmem [shape: f32[3,1,128], index: 5, kind: input, shape index: {}]   ;;  %s556_s6 = inlined_call_operand.vmem [shape: f32[48,128], index: 6, kind: output, shape index: {}]   ;;  %s557_s1 = inlined_call_operand.vmem [shape: s32[3], index: 1, kind: input, shape index: {}]   ;;  %s558_s2 = inlined_call_operand.vmem [shape: s32[3], index: 2, kind: input, shape index: {}]  }
   0x1   :  { %s12_s23 = sshll.u32 %s552_s0, 4  ;;  %s17_s26 = sshll.u32 %s557_s1, 4  ;;  %s13_s23 = int_to_ptr.vmem [resolvable:$true] %s12_s23  ;;  %s18_s26 = int_to_ptr.vmem [resolvable:$true] %s17_s26 }
   0x2   :  { %15 = dma.vmem_to_smem %s13_s23, 16, %s469_s27, [#allocation2] }
   0x3   :  { %20 = dma.vmem_to_smem %s18_s26, 16, %s470_s28, [#allocation2] }
   0x4   :  { %s22_s7 = sshll.u32 %s558_s2, 4  ;;  %s471_s8 = smov [#allocation5]   ;;  %s23_s7 = int_to_ptr.vmem [resolvable:$true] %s22_s7 }
   0x5   :  { %25 = dma.vmem_to_smem %s23_s7, 16, %s471_s8, [#allocation2] }
   0x6   :  { %459 = dma.done.wait [#allocation2], 48 }
   0x7   :  { %460 = vsyncadd [#allocation2], 4294967248 }
   0x8   :  { %28 = sfence }
   0x9   :  { %29 = vsyncpa [#allocation7], 0  ;;  %s519_s0 = smov 0  }
   0xa LB: > { %s149_s2 = sshll.u32 %s554_s4, 4  ;;  %s528_s10 = sadd.s32 4294967295, %s467_s0   ;;  %s467_s0 = sphi %s519_s0, %s35_s0   ;;  %s150_s2 = int_to_ptr.hbm [resolvable:$true] %s149_s2 }
   0xb   : > { %p346_p0 = scmp.ge.s32.totalorder %s467_s0, 1  ;;  %p138_p1 = scmp.lt.s32.totalorder %s467_s0, 4 }
   0xc   : > { %p372_p2 = scmp.eq.s32.totalorder %s528_s10, 0  ;;  %s472_s11 = smov [#allocation6]  }
   0xd   : > { %p139_p3 = pnand %p346_p0, %p138_p1  ;;  %s151_s12 = sshll.u32 %s472_s11, 4  ;;  %s152_s12 = int_to_ptr.vmem [resolvable:$true] %s151_s12 }
   0xe   : > { %s473_s13 = smov 128   ;;  %s474_s14 = smov 8  }
   0xf   : > { %p368_p4 = pneg %p139_p3  ;;  %181 = sbr.rel (%p139_p3) target bundleno = 167 (0xa7), region = 32 }
  0x11   : > { %p369_p5 = pnand %p372_p2, %p368_p4 }
  0x13   : > { %371 = dma.hbm_to_vmem [thread:$0]  (!%p369_p5), %s150_s2, 1536, %s152_s12, [#allocation7], %s473_s13, %s473_s13, %s474_s14  }
  0x14   : > { %462 = dma.done.wait (%p372_p2), [#allocation7], 1536  }
  0x15   : > { %464 = vsyncadd (%p372_p2), [#allocation7], 4294965760  ;;  %s534_s15 = sld [smem:[#allocation4 + %s528_s10]]  ;;  %vm238_vm0 = vcmask 261120  }
  0x16   : > { %s208_s16 = sld [smem:[#allocation3 + %s528_s10]] }
  0x17   : > { %s216_s27 = sld [smem:[#allocation5 + %s528_s10]] }
  0x1b   : > { %s355_s17 = sshll.u32 %s534_s15, 5  ;;  %s233_s20 = scalar_lea.vmem %s555_s5, %s534_s15 }
  0x1c   : > { %s351_s21 = sshll.u32 %s208_s16, 1  ;;  %s228_s22 = scalar_lea.vmem [#allocation6], %s355_s17  ;;  %v388_v6 = vld [vmem:[%s233_s20] ss:$0 sm:$0xff] }
  0x1d   : > { %v232_v0 = vld [vmem:[%s228_s22 + $0x18] sm:$0xff]  ;;  %v231_v1 = vld [vmem:[%s228_s22 + $0x10] sm:$0xff]  ;;  %p210_p6 = scmp.lt.s32.totalorder %s351_s21, 3  ;;  %v230_v2 = vld [vmem:[%s228_s22 + $0x8] sm:$0xff]  ;;  %s353_s28 = sshll.u32 %s216_s27, 1 }
  0x1e   : > { %257 = vmatpush.msra.mxu0 %v232_v0  ;;  %360 = vmatpush.msra.mxu1 %v232_v0  ;;  %v229_v3 = vld [vmem:[%s228_s22] sm:$0xff]  ;;  %p218_p7 = scmp.lt.s32.totalorder %s353_s28, 5 }
  0x1f   : > { %s560_s21 = smov (!%p210_p6, %s351_s21), 3 }
  0x20   : > { %258 = vmatpush.msra.mxu0 %v231_v1  ;;  %361 = vmatpush.msra.mxu1 %v231_v1  ;;  %s352_s23 = sshll.u32 %s560_s21, 3  ;;  %s562_s28 = smov (!%p218_p7, %s353_s28), 5 }
  0x21   : > { %s213_s26 = scalar_lea.vmem %s553_s3, %s352_s23  ;;  %s354_s29 = sshll.u32 %s562_s28, 3 }
  0x22   : > { %259 = vmatpush.msra.mxu0 %v230_v2  ;;  %362 = vmatpush.msra.mxu1 %v230_v2  ;;  %v225_v4 = vld [vmem:[%s213_s26] sm:$0xff]  ;;  %v226_v5 = vld [vmem:[%s213_s26 + $0x8] sm:$0xff]  ;;  %s221_s8 = scalar_lea.vmem %s556_s6, %s354_s29 }
  0x24   : > { %260 = vmatpush.msra.mxu0 %v229_v3  ;;  %363 = vmatpush.msra.mxu1 %v229_v3 }
  0x25   : > { %356 = vmatmul.msk.f32.vlgmr.msra.gmra.mxu0 %vm238_vm0, %v225_v4  ;;  %357 = vmatmul.msk.f32.vlgmr.msra.gmra.mxu1 %vm238_vm0, %v226_v5 }
  0xa2   : > { %v262_v7 = vpop.f32.mrf.mxu0  ;;  %v265_v8 = vpop.f32.mrf.mxu1 }
  0xa3   : > { %v263_v9 = vadd.f32 %v388_v6, %v262_v7  ;;  %v266_v10 = vadd.f32 %v388_v6, %v265_v8 }
  0xa5   : > { %268 = vst [vmem:[%s221_s8] sm:$0xff] %v263_v9 }
  0xa6   : > { %269 = vst [vmem:[%s221_s8 + $0x8] sm:$0xff] %v266_v10 }
  0xa7 PF: > { %s35_s0 = sadd.s32 1, %s467_s0  }
  0xa8   : > { %p32_p8 = scmp.ge.s32.totalorder %s35_s0, 5  }
  0xaa   :  { %34 = sbr.rel (!%p32_p8) target bundleno = 10 (0xa), region = 69 }
  0xaf   :  { %295 = vsyncpa [#allocation7], 1 }
  0xb0   :  { %297 = vsyncpa [#allocation7 + $0x1], 1 }

</bundles_post_ra>
